<compile_context>
chip_gen: v5e
topology: v5e:2x2
jax: 0.10.0
libtpu: 0.0.40
codegen_flags: <defaults>
</compile_context>

<pallas_src>
import jax
import jax.numpy as jnp
from jax.experimental import pallas as pl
from jax.experimental.pallas import tpu as pltpu

BATCH = 2
INPUT_SIZE = 100
HIDDEN_SIZE = 32
OUTPUT_SIZE = 10

# Rows per grid step on the pipelined path.  At tb=4096: x tile ~2 MiB +
# out tile 2 MiB, x2 double-buffering, + ~0.25 MiB resident weights ~= 8.5 MiB
# -- fits v7x's 32 MiB scoped-default VMEM (and easily v5e/v6e).
BATCH_TILE = 4096

# Batches at or below this go through one gridless, all-VMEM invocation.
TINY_BATCH = 256


def _round_up(n: int, m: int) -> int:
    return pl.cdiv(n, m) * m


def mlp_kernel(x_ref, w1_ref, b1_ref, w2_ref, o_ref):
    # Layer 1: (tb, In) @ (In, H_p), f32 accumulation on the MXU.
    h = jnp.dot(x_ref[...], w1_ref[...], preferred_element_type=jnp.float32)
    # Custom Relu.forward == clamp(min=0).  The spare hidden lane H carries
    # ReLU(0*x + 1) == 1 so that w2 row H (holding b2) acts as the bias.
    h = jnp.maximum(h + b1_ref[...], 0.0)
    # Layer 2: (tb, H_p) @ (H_p, Out_p); b2 already folded into w2.
    y = jnp.dot(h.astype(w2_ref.dtype), w2_ref[...],
                preferred_element_type=jnp.float32)
    o_ref[...] = y.astype(o_ref.dtype)


def net_forward(x, w1, b1, w2, b2, *, batch_tile=BATCH_TILE,
                io_dtype=jnp.float32):
    """Forward pass.  Weights are stored transposed vs. torch.nn.Linear:
    w1:(In,H) b1:(1,H) w2:(H,Out) b2:(1,Out) -> plain row-major MXU matmuls."""
    B, In = x.shape
    H = w1.shape[1]
    Out = w2.shape[1]

    # Lane-pad only the tiny weight/bias tensors.  H is padded to at least
    # H+1 lanes so a spare hidden lane exists to carry the folded b2.
    H_p = _round_up(H + 1, 128)
    Out_p = _round_up(Out, 128)

    w1p = jnp.zeros((In, H_p), jnp.float32).at[:, :H].set(w1)
    # Spare lane H: w1 column stays 0, bias lane = 1  =>  ReLU(0*x + 1) == 1.
    b1p = jnp.zeros((1, H_p), jnp.float32).at[:, :H].set(b1).at[0, H].set(1.0)
    # b2 folded into w2 row H (multiplied by that constant-1 hidden lane).
    w2p = (jnp.zeros((H_p, Out_p), jnp.float32)
           .at[:H, :Out].set(w2)
           .at[H, :Out].set(b2[0]))

    w1p = w1p.astype(io_dtype)
    b1p = b1p.astype(io_dtype)
    w2p = w2p.astype(io_dtype)

    if B <= TINY_BATCH:
        # Latency-bound tiny case: single gridless invocation, everything in
        # VMEM, no pipeline machinery.  The row pad here is a few KiB at most.
        B_p = _round_up(B, 8)
        xp = jnp.zeros((B_p, In), io_dtype).at[:B].set(x.astype(io_dtype))
        yp = pl.pallas_call(
            mlp_kernel,
            out_shape=jax.ShapeDtypeStruct((B_p, Out_p), jnp.float32),
            in_specs=[pl.BlockSpec(memory_space=pltpu.MemorySpace.VMEM)] * 4,
            out_specs=pl.BlockSpec(memory_space=pltpu.MemorySpace.VMEM),
        )(xp, w1p, b1p, w2p)
    else:
        # Pipelined path: x passed UNPADDED, weights VMEM-resident (constant
        # index_map).  At least two (even-count) balanced batch tiles so both
        # v7x TensorCores are used; B is not padded up to a tile multiple --
        # the final partial tile is handled by Pallas (rows are independent).
        n_tiles = max(2, pl.cdiv(B, batch_tile))
        n_tiles += n_tiles % 2
        tb = _round_up(pl.cdiv(B, n_tiles), 8)
        grid = (pl.cdiv(B, tb),)

        yp = pl.pallas_call(
            mlp_kernel,
            out_shape=jax.ShapeDtypeStruct((B, Out_p), jnp.float32),
            grid=grid,
            in_specs=[
                pl.BlockSpec((tb, In), lambda i: (i, 0)),      # x tile
                pl.BlockSpec((In, H_p), lambda i: (0, 0)),     # w1 (resident)
                pl.BlockSpec((1, H_p), lambda i: (0, 0)),      # b1 (resident)
                pl.BlockSpec((H_p, Out_p), lambda i: (0, 0)),  # w2+b2 (resident)
            ],
            out_specs=pl.BlockSpec((tb, Out_p), lambda i: (i, 0)),
            compiler_params=pltpu.CompilerParams(
                dimension_semantics=("parallel",),
            ),
        )(x.astype(io_dtype), w1p, b1p, w2p)

    # Lane-dense (B, 128) slab -> module contract (B, 10).  A fused downstream
    # consumer could read the padded slab directly and skip this extra pass.
    return yp[:B, :Out]


def init_params(key):
    # Deterministic init mimicking torch.nn.Linear's U(-1/sqrt(fan_in), +1/sqrt(fan_in)).
    k1, k2, k3, k4 = jax.random.split(key, 4)
    bound1 = 1.0 / jnp.sqrt(INPUT_SIZE)
    bound2 = 1.0 / jnp.sqrt(HIDDEN_SIZE)
    w1 = jax.random.uniform(k1, (INPUT_SIZE, HIDDEN_SIZE), jnp.float32,
                            -bound1, bound1)
    b1 = jax.random.uniform(k2, (1, HIDDEN_SIZE), jnp.float32, -bound1, bound1)
    w2 = jax.random.uniform(k3, (HIDDEN_SIZE, OUTPUT_SIZE), jnp.float32,
                            -bound2, bound2)
    b2 = jax.random.uniform(k4, (1, OUTPUT_SIZE), jnp.float32, -bound2, bound2)
    return w1, b1, w2, b2


if __name__ == "__main__":
    key = jax.random.PRNGKey(0)
    k_in, k_par = jax.random.split(key)
    x = jax.random.normal(k_in, (BATCH, INPUT_SIZE), jnp.float32)
    w1, b1, w2, b2 = init_params(k_par)

    def reference(xv):
        return jnp.maximum(xv @ w1 + b1, 0.0) @ w2 + b2

    # Module-spec shapes (batch=2): tiny gridless path.
    out = jax.block_until_ready(net_forward(x, w1, b1, w2, b2))
    assert out.shape == (BATCH, OUTPUT_SIZE)
    assert jnp.allclose(out, reference(x), atol=1e-5, rtol=1e-5)

    # Also exercise the pipelined large-batch path (two "parallel" tiles).
    x_big = jax.random.normal(jax.random.PRNGKey(1), (4096, INPUT_SIZE),
                              jnp.float32)
    out_big = jax.block_until_ready(net_forward(x_big, w1, b1, w2, b2))
    assert out_big.shape == (4096, OUTPUT_SIZE)
    assert jnp.allclose(out_big, reference(x_big), atol=1e-4, rtol=1e-4)

    # TODO(synk): custom Relu.backward (autograd) is training-only and not
    # part of this forward kernel.

    print("KERNEL_OK")
</pallas_src>

<mosaic_0001>
module attributes {stable_mosaic.version = 11 : i64} {
  func.func @mlp_kernel(%arg0: memref<8x100xf32, #tpu.memory_space<vmem>>, %arg1: memref<100x128xf32, #tpu.memory_space<vmem>>, %arg2: memref<1x128xf32, #tpu.memory_space<vmem>>, %arg3: memref<128x128xf32, #tpu.memory_space<vmem>>, %arg4: memref<8x128xf32, #tpu.memory_space<vmem>>) attributes {dimension_semantics = [], scalar_prefetch = 0 : i64, scratch_operands = 0 : i64, tpu.core_type = #tpu.core_type<tc>} {
    %c0 = arith.constant 0 : index
    %c0_0 = arith.constant 0 : index
    %0 = vector.load %arg0[%c0, %c0_0] : memref<8x100xf32, #tpu.memory_space<vmem>>, vector<8x100xf32>
    %c0_1 = arith.constant 0 : index
    %c0_2 = arith.constant 0 : index
    %1 = vector.load %arg1[%c0_1, %c0_2] : memref<100x128xf32, #tpu.memory_space<vmem>>, vector<100x128xf32>
    %cst = arith.constant dense<0.000000e+00> : vector<8x128xf32>
    %2 = tpu.matmul %0, %1, %cst {dimension_numbers = #tpu.dot_dimension_numbers<[1], [0], [0], [1], [0, 0, 1, 1], [], []>} : vector<8x100xf32>, vector<100x128xf32>, vector<8x128xf32> -> vector<8x128xf32>
    %c0_3 = arith.constant 0 : index
    %c0_4 = arith.constant 0 : index
    %3 = vector.load %arg2[%c0_3, %c0_4] : memref<1x128xf32, #tpu.memory_space<vmem>>, vector<1x128xf32>
    %4 = vector.broadcast %3 : vector<1x128xf32> to vector<8x128xf32>
    %5 = arith.addf %2, %4 : vector<8x128xf32>
    %cst_5 = arith.constant 0.000000e+00 : f32
    %6 = vector.broadcast %cst_5 : f32 to vector<8x128xf32>
    %7 = arith.maximumf %5, %6 : vector<8x128xf32>
    %c0_6 = arith.constant 0 : index
    %c0_7 = arith.constant 0 : index
    %8 = vector.load %arg3[%c0_6, %c0_7] : memref<128x128xf32, #tpu.memory_space<vmem>>, vector<128x128xf32>
    %cst_8 = arith.constant dense<0.000000e+00> : vector<8x128xf32>
    %9 = tpu.matmul %7, %8, %cst_8 {dimension_numbers = #tpu.dot_dimension_numbers<[1], [0], [0], [1], [0, 0, 1, 1], [], []>} : vector<8x128xf32>, vector<128x128xf32>, vector<8x128xf32> -> vector<8x128xf32>
    %c0_9 = arith.constant 0 : index
    %c0_10 = arith.constant 0 : index
    %10 = vector.load %arg4[%c0_9, %c0_10] : memref<8x128xf32, #tpu.memory_space<vmem>>, vector<8x128xf32>
    tpu.vector_store %arg4[%c0_9, %c0_10], %9 {strides = array<i32>} : memref<8x128xf32, #tpu.memory_space<vmem>>, vector<8x128xf32>,
    return
  }
}

</mosaic_0001>

<bundles_post_ra>
// kernel: tpu_custom_call.1
= control target key start
LH: loop header
LB: loop body
LE: loop exit
PB: predicated region body
PF: predicated region fallthrough
CT: control target
= control target key end

     0   :  { %9 = vsyncpa [#allocation3], 0  ;;  %s322_s0 = inlined_call_operand.hbm [shape: f32[8,100], index: 0, kind: input, shape index: {}]   ;;  %s323_s1 = inlined_call_operand.hbm [shape: f32[100,128], index: 1, kind: input, shape index: {}]   ;;  %s324_s2 = inlined_call_operand.vmem [shape: f32[1,128], index: 2, kind: input, shape index: {}]   ;;  %s325_s3 = inlined_call_operand.hbm [shape: f32[128,128], index: 3, kind: input, shape index: {}]   ;;  %s326_s4 = inlined_call_operand.hbm [shape: f32[8,128], index: 4, kind: output, shape index: {}]  }
   0x1   :  { %10 = vsyncpa [#allocation6], 0  ;;  %s27_s17 = sshll.u32 %s323_s1, 4  ;;  %s28_s17 = int_to_ptr.hbm [resolvable:$true] %s27_s17 }
   0x2   :  { %11 = vsyncpa [#allocation4], 0  ;;  %s276_s18 = smov [#allocation5]   ;;  %s17_s22 = sshll.u32 %s322_s0, 4  ;;  %s18_s22 = int_to_ptr.hbm [resolvable:$true] %s17_s22 }
   0x3   :  { %s29_s19 = sshll.u32 %s276_s18, 4  ;;  %s277_s23 = smov 128   ;;  %s30_s19 = int_to_ptr.vmem [resolvable:$true] %s29_s19 }
   0x4   :  { %s278_s24 = smov 8   ;;  %s279_s25 = smov [#allocation2]  }
   0x5   :  { %35 = dma.hbm_to_vmem [thread:$0]  %s28_s17, 1664, %s30_s19, [#allocation6], %s277_s23, %s277_s23, %s278_s24  }
   0x6   :  { %s19_s26 = sshll.u32 %s279_s25, 4  ;;  %s42_s29 = sshll.u32 %s325_s3, 4  ;;  %s20_s26 = int_to_ptr.vmem [resolvable:$true] %s19_s26  ;;  %s43_s29 = int_to_ptr.hbm [resolvable:$true] %s42_s29 }
   0x7   :  { %22 = dma.hbm_to_vmem [thread:$0]  %s18_s22, 128, %s20_s26, [#allocation3]  }
   0x8   :  { %s280_s1 = smov [#allocation7]  }
   0x9   :  { %s44_s30 = sshll.u32 %s280_s1, 4  ;;  %s45_s30 = int_to_ptr.vmem [resolvable:$true] %s44_s30 }
   0xa   :  { %50 = dma.hbm_to_vmem [thread:$0]  %s43_s29, 2048, %s45_s30, [#allocation6], %s277_s23, %s277_s23, %s278_s24  }
   0xb   :  { %270 = dma.done.wait [#allocation3], 128  }
   0xc   :  { %271 = vsyncadd [#allocation3], 4294967168 }
   0xd   :  { %272 = dma.done.wait [#allocation6], 3712  }
   0xe   :  { %273 = vsyncadd [#allocation6], 4294963584  ;;  %vm85_vm0 = vcmask 1043456   ;;  %v76_v0 = vld [vmem:[#allocation5 + $0x60] sm:$0xf]  ;;  %v75_v1 = vld [vmem:[#allocation5 + $0x58] sm:$0xff] }
   0xf   :  { %165 = vmatpush.msk.msra.mxu0 %vm85_vm0, %v76_v0  ;;  %v74_v2 = vld [vmem:[#allocation5 + $0x50] sm:$0xff]  ;;  %v73_v3 = vld [vmem:[#allocation5 + $0x48] sm:$0xff]  ;;  %v125_v4 = vld [vmem:[#allocation7 + $0x78] sm:$0xff]  ;;  %vm81_vm1 = vcmask 818176   ;;  %s281_s5 = smov [#allocation8]   ;;  %s154_s9 = sshll.u32 %s326_s4, 4  ;;  %s155_s9 = int_to_ptr.hbm [resolvable:$true] %s154_s9 }
  0x10   :  { %126 = vmatpush.msra.mxu1 %v125_v4  ;;  %v124_v5 = vld [vmem:[#allocation7 + $0x70] sm:$0xff]  ;;  %v72_v6 = vld [vmem:[#allocation5 + $0x40] sm:$0xff]  ;;  %v123_v7 = vld [vmem:[#allocation7 + $0x68] sm:$0xff]  ;;  %s152_s6 = sshll.u32 %s281_s5, 4  ;;  %s153_s6 = int_to_ptr.vmem [resolvable:$true] %s152_s6 }
  0x11   :  { %93 = vmatpush.msra.mxu0 %v75_v1  ;;  %v71_v8 = vld [vmem:[#allocation5 + $0x38] sm:$0xff]  ;;  %v122_v9 = vld [vmem:[#allocation7 + $0x60] sm:$0xff]  ;;  %v70_v10 = vld [vmem:[#allocation5 + $0x30] sm:$0xff] }
  0x12   :  { %127 = vmatpush.msra.mxu1 %v124_v5  ;;  %v121_v11 = vld [vmem:[#allocation7 + $0x58] sm:$0xff]  ;;  %v69_v12 = vld [vmem:[#allocation5 + $0x28] sm:$0xff]  ;;  %v120_v13 = vld [vmem:[#allocation7 + $0x50] sm:$0xff] }
  0x13   :  { %94 = vmatpush.msra.mxu0 %v74_v2  ;;  %v68_v14 = vld [vmem:[#allocation5 + $0x20] sm:$0xff]  ;;  %v119_v15 = vld [vmem:[#allocation7 + $0x48] sm:$0xff]  ;;  %v67_v16 = vld [vmem:[#allocation5 + $0x18] sm:$0xff] }
  0x14   :  { %128 = vmatpush.msra.mxu1 %v123_v7  ;;  %v118_v17 = vld [vmem:[#allocation7 + $0x40] sm:$0xff]  ;;  %v66_v18 = vld [vmem:[#allocation5 + $0x10] sm:$0xff]  ;;  %v117_v19 = vld [vmem:[#allocation7 + $0x38] sm:$0xff] }
  0x15   :  { %95 = vmatpush.msra.mxu0 %v73_v3  ;;  %v65_v20 = vld [vmem:[#allocation5 + $0x8] sm:$0xff]  ;;  %v116_v21 = vld [vmem:[#allocation7 + $0x30] sm:$0xff]  ;;  %v64_v22 = vld [vmem:[#allocation5] sm:$0xff] }
  0x16   :  { %129 = vmatpush.msra.mxu1 %v122_v9  ;;  %v115_v23 = vld [vmem:[#allocation7 + $0x28] sm:$0xff]  ;;  %v63_v24 = vld [vmem:[#allocation2] sm:$0xff]  ;;  %v114_v25 = vld [vmem:[#allocation7 + $0x20] sm:$0xff] }
  0x17   :  { %96 = vmatpush.msra.mxu0 %v72_v6  ;;  %v113_v26 = vld [vmem:[#allocation7 + $0x18] sm:$0xff]  ;;  %v112_v27 = vld [vmem:[#allocation7 + $0x10] sm:$0xff]  ;;  %v111_v28 = vld [vmem:[#allocation7 + $0x8] sm:$0xff] }
  0x18   :  { %130 = vmatpush.msra.mxu1 %v121_v11  ;;  %v110_v29 = vld [vmem:[#allocation7] sm:$0xff]  ;;  %v173_v30 = vld [vmem:[%s324_s2] ss:$0 sm:$0xff] }
  0x19   :  { %97 = vmatpush.msra.mxu0 %v71_v8 }
  0x1a   :  { %131 = vmatpush.msra.mxu1 %v120_v13 }
  0x1b   :  { %98 = vmatpush.msra.mxu0 %v70_v10 }
  0x1c   :  { %132 = vmatpush.msra.mxu1 %v119_v15 }
  0x1d   :  { %99 = vmatpush.msra.mxu0 %v69_v12 }
  0x1e   :  { %133 = vmatpush.msra.mxu1 %v118_v17 }
  0x1f   :  { %100 = vmatpush.msra.mxu0 %v68_v14 }
  0x20   :  { %134 = vmatpush.msra.mxu1 %v117_v19 }
  0x21   :  { %101 = vmatpush.msra.mxu0 %v67_v16 }
  0x22   :  { %135 = vmatpush.msra.mxu1 %v116_v21 }
  0x23   :  { %102 = vmatpush.msra.mxu0 %v66_v18 }
  0x24   :  { %136 = vmatpush.msra.mxu1 %v115_v23 }
  0x25   :  { %103 = vmatpush.msra.mxu0 %v65_v20 }
  0x26   :  { %137 = vmatpush.msra.mxu1 %v114_v25 }
  0x27   :  { %104 = vmatpush.msra.mxu0 %v64_v22 }
  0x28   :  { %166 = vmatmul.msk.f32.vlgmr.msra.gmra.mxu0 %vm81_vm1, %v63_v24  ;;  %138 = vmatpush.msra.mxu1 %v113_v26 }
  0x2a   :  { %139 = vmatpush.msra.mxu1 %v112_v27 }
  0x2c   :  { %140 = vmatpush.msra.mxu1 %v111_v28 }
  0x2e   :  { %141 = vmatpush.msra.mxu1 %v110_v29 }
  0xa5   :  { %v106_v31 = vpop.f32.mrf.mxu0 }
  0xa6   :  { %v107_v32 = vadd.f32 %v173_v30, %v106_v31 }
  0xa8   :  { %v109_v33 = vmax.f32 %v107_v32, 0.0 }
  0xaa   :  { %142 = vmatmul.f32.vlgmr.msra.gmra.mxu1 %v109_v33 }
 0x127   :  { %v143_v34 = vpop.f32.mrf.mxu1 }
 0x128   :  { %146 = vst [vmem:[#allocation8] sm:$0xff] %v143_v34 }
 0x129   :  { %157 = dma.vmem_to_hbm [thread:$0]  %s153_s6, 128, %s155_s9, [#allocation4]  }
 0x12a   :  { %274 = dma.done.wait [#allocation4], 128  }
 0x12b   :  { %275 = vsyncadd [#allocation4], 4294967168 }
 0x12c   :  { %162 = vsyncpa [#allocation3], 1 }
 0x12d   :  { %163 = vsyncpa [#allocation6], 1 }
 0x12e   :  { %164 = vsyncpa [#allocation4], 1 }

</bundles_post_ra>
